<compile_context>
chip_gen: v7x
topology: tpu7x:2x2x1
jax: 0.10.0
libtpu: 0.0.40
codegen_flags: <defaults>
</compile_context>

<pallas_src>
import jax
import jax.numpy as jnp
import numpy as np
from jax import lax
from jax.experimental import pallas as pl
from jax.experimental.pallas import tpu as pltpu

HIDDEN = 128
LANE = 128
EPS = 1e-5


def actor_kernel(x_ref, w0_ref, wr_ref, vec_ref, out_ref):
    """Full ActorNN forward on one VMEM-resident batch.

    x_ref   : (B, input_size)  f32
    w0_ref  : (input_size, 128) f32          -- first Linear, unpadded K
    wr_ref  : (4, 128, 128)     bf16         -- [w1, w2, w3, wf (lane-padded)]
    vec_ref : (13, 128)         f32          -- [b0..b3, bf_pad, gamma0..3, beta0..3]
    out_ref : (B, output_size)  f32
    """
    out_size = out_ref.shape[1]
    x = x_ref[...]  # f32 (B, input_size)
    for i in range(4):
        # Linear (+bias) -> ReLU.  Layer 0 is f32 (tiny K); layers 1..3 are bf16 MXU / f32 acc.
        if i == 0:
            h = jnp.dot(x, w0_ref[...], preferred_element_type=jnp.float32)
        else:
            h = jnp.dot(x, wr_ref[i - 1], preferred_element_type=jnp.float32)
        h = h + vec_ref[pl.ds(i, 1), :]
        h = jnp.maximum(h, 0.0)
        # BatchNorm1d training-mode batch stats, two-pass (PyTorch-accurate) variance.
        mean = jnp.mean(h, axis=0, keepdims=True)          # (1, 128)
        d = h - mean
        var = jnp.mean(d * d, axis=0, keepdims=True)       # biased variance
        gamma = vec_ref[pl.ds(5 + i, 1), :]
        beta = vec_ref[pl.ds(9 + i, 1), :]
        scale = gamma * lax.rsqrt(var + EPS)               # rsqrt -> EUP slot
        # (h - mean) * scale + beta  == gamma * (h - mean)/sqrt(var+eps) + beta
        x = (d * scale + beta).astype(jnp.bfloat16)        # bf16 only for the next MXU op
    # Final Linear (lane-padded weights) + tanh; slice to the real output width in-vreg.
    y = jnp.dot(x, wr_ref[3], preferred_element_type=jnp.float32) + vec_ref[pl.ds(4, 1), :]
    out_ref[...] = jnp.tanh(y[:, :out_size])


def make_params(input_size, output_size, key):
    """Deterministic parameter init mirroring ActorNN.__init__.

    Hidden Linear weights: uniform(+-sqrt(1/out_features)) (init_hidden uses weight.size()[0]
    == out_features == 128).  Final weights: uniform(+-0.003).  Biases keep the PyTorch Linear
    default uniform(+-1/sqrt(fan_in)) (init_params does not touch biases).  BN: gamma=1, beta=0.

    Packed layout (3 arrays total, coalesced DMAs):
      w0     : (input_size, 128) f32
      w_rest : (4, 128, 128)     bf16   [w1, w2, w3, wf zero-padded to 128 lanes]
      vecs   : (13, 128)         f32    [b0..b3, bf zero-padded, gamma0..3, beta0..3]
    """
    assert output_size <= LANE, "output_size must fit in one 128-lane tile"
    keys = jax.random.split(key, 10)
    ki = iter(keys)
    lim_w = float(np.sqrt(1.0 / HIDDEN))   # out_features = 128 for every hidden layer

    # Layer 0 (input_size -> 128), kept f32 and unpadded along K.
    w0 = jax.random.uniform(next(ki), (input_size, HIDDEN), jnp.float32, -lim_w, lim_w)
    b0 = jax.random.uniform(next(ki), (HIDDEN,), jnp.float32,
                            -float(np.sqrt(1.0 / input_size)), float(np.sqrt(1.0 / input_size)))

    hidden_ws, biases = [], [b0]
    for _ in range(3):
        w = jax.random.uniform(next(ki), (HIDDEN, HIDDEN), jnp.float32, -lim_w, lim_w)
        b = jax.random.uniform(next(ki), (HIDDEN,), jnp.float32, -lim_w, lim_w)
        hidden_ws.append(w)
        biases.append(b)

    # Final layer (128 -> output_size), zero-padded to 128 lanes (exact for the matmul).
    wf = jax.random.uniform(next(ki), (HIDDEN, output_size), jnp.float32, -0.003, 0.003)
    wf_pad = jnp.zeros((HIDDEN, LANE), jnp.float32).at[:, :output_size].set(wf)
    bf = jax.random.uniform(next(ki), (output_size,), jnp.float32, -lim_w, lim_w)
    bf_pad = jnp.zeros((LANE,), jnp.float32).at[:output_size].set(bf)

    w_rest = jnp.stack(hidden_ws + [wf_pad], axis=0).astype(jnp.bfloat16)  # (4,128,128)

    gamma = jnp.ones((4, HIDDEN), jnp.float32)
    beta = jnp.zeros((4, HIDDEN), jnp.float32)
    vecs = jnp.concatenate(
        [jnp.stack(biases, axis=0), bf_pad[None, :], gamma, beta], axis=0)  # (13,128)
    return w0, w_rest, vecs


def actor_forward(state, params, output_size):
    """Run the fused kernel directly on the raw f32 state -- no wrapper pad/cast/slice ops."""
    w0, w_rest, vecs = params
    batch, input_size = state.shape
    flops = 2 * batch * HIDDEN * (input_size + 3 * HIDDEN + HIDDEN)
    transcendentals = batch * output_size + 4 * HIDDEN
    bytes_accessed = (state.size + w0.size + vecs.size + batch * output_size) * 4 + w_rest.size * 2
    return pl.pallas_call(
        actor_kernel,
        out_shape=jax.ShapeDtypeStruct((batch, output_size), jnp.float32),
        in_specs=[pl.BlockSpec(memory_space=pltpu.MemorySpace.VMEM)] * 4,
        out_specs=pl.BlockSpec(memory_space=pltpu.MemorySpace.VMEM),
        cost_estimate=pl.CostEstimate(flops=flops,
                                      transcendentals=transcendentals,
                                      bytes_accessed=bytes_accessed),
    )(state, w0, w_rest, vecs)


def actor_forward_ref(state, params, output_size):
    """Pure-JAX reference mirroring the kernel math (f32 first layer, bf16 MXU after)."""
    w0, w_rest, vecs = params
    x = state
    for i in range(4):
        if i == 0:
            h = jnp.dot(x, w0, preferred_element_type=jnp.float32)
        else:
            h = jnp.dot(x, w_rest[i - 1], preferred_element_type=jnp.float32)
        h = jnp.maximum(h + vecs[i:i + 1, :], 0.0)
        mean = jnp.mean(h, axis=0, keepdims=True)
        d = h - mean
        var = jnp.mean(d * d, axis=0, keepdims=True)
        scale = vecs[5 + i:6 + i, :] * lax.rsqrt(var + EPS)
        x = (d * scale + vecs[9 + i:10 + i, :]).astype(jnp.bfloat16)
    y = jnp.dot(x, w_rest[3], preferred_element_type=jnp.float32) + vecs[4:5, :]
    return jnp.tanh(y)[:, :output_size]


if __name__ == "__main__":
    batch = 8           # BatchNorm1d training-mode stats need batch > 1
    input_size = 16
    output_size = 4

    key = jax.random.PRNGKey(0)
    k_x, k_p = jax.random.split(key)
    state = jax.random.normal(k_x, (batch, input_size), jnp.float32)
    params = make_params(input_size, output_size, k_p)

    out = actor_forward(state, params, output_size)
    out = jax.block_until_ready(out)

    ref = actor_forward_ref(state, params, output_size)
    # bf16 MXU activations in both paths; allow for FMA-contraction / reduction-order drift.
    np.testing.assert_allclose(np.asarray(out), np.asarray(ref), rtol=2e-2, atol=2e-2)

    print("KERNEL_OK")
</pallas_src>

<mosaic_0001>
module attributes {stable_mosaic.version = 11 : i64} {
  func.func @actor_kernel(%arg0: memref<8x16xf32, #tpu.memory_space<vmem>>, %arg1: memref<16x128xf32, #tpu.memory_space<vmem>>, %arg2: memref<4x128x128xbf16, #tpu.memory_space<vmem>>, %arg3: memref<13x128xf32, #tpu.memory_space<vmem>>, %arg4: memref<8x4xf32, #tpu.memory_space<vmem>>) attributes {dimension_semantics = [], scalar_prefetch = 0 : i64, scratch_operands = 0 : i64, tpu.core_type = #tpu.core_type<tc>} {
    %c0 = arith.constant 0 : index
    %c0_0 = arith.constant 0 : index
    %0 = vector.load %arg0[%c0, %c0_0] : memref<8x16xf32, #tpu.memory_space<vmem>>, vector<8x16xf32>
    %c0_1 = arith.constant 0 : index
    %c0_2 = arith.constant 0 : index
    %1 = vector.load %arg1[%c0_1, %c0_2] : memref<16x128xf32, #tpu.memory_space<vmem>>, vector<16x128xf32>
    %cst = arith.constant dense<0.000000e+00> : vector<8x128xf32>
    %2 = tpu.matmul %0, %1, %cst {dimension_numbers = #tpu.dot_dimension_numbers<[1], [0], [0], [1], [0, 0, 1, 1], [], []>} : vector<8x16xf32>, vector<16x128xf32>, vector<8x128xf32> -> vector<8x128xf32>
    %c0_3 = arith.constant 0 : index
    %c0_4 = arith.constant 0 : index
    %3 = vector.load %arg3[%c0_3, %c0_4] : memref<13x128xf32, #tpu.memory_space<vmem>>, vector<1x128xf32>
    %4 = vector.broadcast %3 : vector<1x128xf32> to vector<8x128xf32>
    %5 = arith.addf %2, %4 : vector<8x128xf32>
    %cst_5 = arith.constant 0.000000e+00 : f32
    %6 = vector.broadcast %cst_5 : f32 to vector<8x128xf32>
    %7 = arith.maximumf %5, %6 : vector<8x128xf32>
    %cst_6 = arith.constant dense<0.000000e+00> : vector<128xf32>
    %8 = vector.multi_reduction <add>, %7, %cst_6 [0] : vector<8x128xf32> to vector<128xf32>
    %9 = vector.shape_cast %8 : vector<128xf32> to vector<1x128xf32>
    %cst_7 = arith.constant 8.000000e+00 : f32
    %10 = vector.broadcast %cst_7 : f32 to vector<1x128xf32>
    %11 = arith.divf %9, %10 : vector<1x128xf32>
    %12 = vector.broadcast %11 : vector<1x128xf32> to vector<8x128xf32>
    %13 = arith.subf %7, %12 : vector<8x128xf32>
    %14 = arith.mulf %13, %13 : vector<8x128xf32>
    %cst_8 = arith.constant dense<0.000000e+00> : vector<128xf32>
    %15 = vector.multi_reduction <add>, %14, %cst_8 [0] : vector<8x128xf32> to vector<128xf32>
    %16 = vector.shape_cast %15 : vector<128xf32> to vector<1x128xf32>
    %cst_9 = arith.constant 8.000000e+00 : f32
    %17 = vector.broadcast %cst_9 : f32 to vector<1x128xf32>
    %18 = arith.divf %16, %17 : vector<1x128xf32>
    %c5 = arith.constant 5 : index
    %c0_10 = arith.constant 0 : index
    %19 = vector.load %arg3[%c5, %c0_10] : memref<13x128xf32, #tpu.memory_space<vmem>>, vector<1x128xf32>
    %c9 = arith.constant 9 : index
    %c0_11 = arith.constant 0 : index
    %20 = vector.load %arg3[%c9, %c0_11] : memref<13x128xf32, #tpu.memory_space<vmem>>, vector<1x128xf32>
    %cst_12 = arith.constant 9.99999974E-6 : f32
    %21 = vector.broadcast %cst_12 : f32 to vector<1x128xf32>
    %22 = arith.addf %18, %21 : vector<1x128xf32>
    %23 = math.rsqrt %22 : vector<1x128xf32>
    %24 = arith.mulf %19, %23 : vector<1x128xf32>
    %25 = vector.broadcast %24 : vector<1x128xf32> to vector<8x128xf32>
    %26 = arith.mulf %13, %25 : vector<8x128xf32>
    %27 = vector.broadcast %20 : vector<1x128xf32> to vector<8x128xf32>
    %28 = arith.addf %26, %27 : vector<8x128xf32>
    %29 = arith.truncf %28 : vector<8x128xf32> to vector<8x128xbf16>
    %c0_13 = arith.constant 0 : index
    %c0_14 = arith.constant 0 : index
    %c0_15 = arith.constant 0 : index
    %30 = vector.load %arg2[%c0_13, %c0_14, %c0_15] : memref<4x128x128xbf16, #tpu.memory_space<vmem>>, vector<1x128x128xbf16>
    %31 = vector.shape_cast %30 : vector<1x128x128xbf16> to vector<128x128xbf16>
    %cst_16 = arith.constant dense<0.000000e+00> : vector<8x128xf32>
    %32 = tpu.matmul %29, %31, %cst_16 {dimension_numbers = #tpu.dot_dimension_numbers<[1], [0], [0], [1], [0, 0, 1, 1], [], []>} : vector<8x128xbf16>, vector<128x128xbf16>, vector<8x128xf32> -> vector<8x128xf32>
    %c1 = arith.constant 1 : index
    %c0_17 = arith.constant 0 : index
    %33 = vector.load %arg3[%c1, %c0_17] : memref<13x128xf32, #tpu.memory_space<vmem>>, vector<1x128xf32>
    %34 = vector.broadcast %33 : vector<1x128xf32> to vector<8x128xf32>
    %35 = arith.addf %32, %34 : vector<8x128xf32>
    %cst_18 = arith.constant 0.000000e+00 : f32
    %36 = vector.broadcast %cst_18 : f32 to vector<8x128xf32>
    %37 = arith.maximumf %35, %36 : vector<8x128xf32>
    %cst_19 = arith.constant dense<0.000000e+00> : vector<128xf32>
    %38 = vector.multi_reduction <add>, %37, %cst_19 [0] : vector<8x128xf32> to vector<128xf32>
    %39 = vector.shape_cast %38 : vector<128xf32> to vector<1x128xf32>
    %cst_20 = arith.constant 8.000000e+00 : f32
    %40 = vector.broadcast %cst_20 : f32 to vector<1x128xf32>
    %41 = arith.divf %39, %40 : vector<1x128xf32>
    %42 = vector.broadcast %41 : vector<1x128xf32> to vector<8x128xf32>
    %43 = arith.subf %37, %42 : vector<8x128xf32>
    %44 = arith.mulf %43, %43 : vector<8x128xf32>
    %cst_21 = arith.constant dense<0.000000e+00> : vector<128xf32>
    %45 = vector.multi_reduction <add>, %44, %cst_21 [0] : vector<8x128xf32> to vector<128xf32>
    %46 = vector.shape_cast %45 : vector<128xf32> to vector<1x128xf32>
    %cst_22 = arith.constant 8.000000e+00 : f32
    %47 = vector.broadcast %cst_22 : f32 to vector<1x128xf32>
    %48 = arith.divf %46, %47 : vector<1x128xf32>
    %c6 = arith.constant 6 : index
    %c0_23 = arith.constant 0 : index
    %49 = vector.load %arg3[%c6, %c0_23] : memref<13x128xf32, #tpu.memory_space<vmem>>, vector<1x128xf32>
    %c10 = arith.constant 10 : index
    %c0_24 = arith.constant 0 : index
    %50 = vector.load %arg3[%c10, %c0_24] : memref<13x128xf32, #tpu.memory_space<vmem>>, vector<1x128xf32>
    %cst_25 = arith.constant 9.99999974E-6 : f32
    %51 = vector.broadcast %cst_25 : f32 to vector<1x128xf32>
    %52 = arith.addf %48, %51 : vector<1x128xf32>
    %53 = math.rsqrt %52 : vector<1x128xf32>
    %54 = arith.mulf %49, %53 : vector<1x128xf32>
    %55 = vector.broadcast %54 : vector<1x128xf32> to vector<8x128xf32>
    %56 = arith.mulf %43, %55 : vector<8x128xf32>
    %57 = vector.broadcast %50 : vector<1x128xf32> to vector<8x128xf32>
    %58 = arith.addf %56, %57 : vector<8x128xf32>
    %59 = arith.truncf %58 : vector<8x128xf32> to vector<8x128xbf16>
    %c1_26 = arith.constant 1 : index
    %c0_27 = arith.constant 0 : index
    %c0_28 = arith.constant 0 : index
    %60 = vector.load %arg2[%c1_26, %c0_27, %c0_28] : memref<4x128x128xbf16, #tpu.memory_space<vmem>>, vector<1x128x128xbf16>
    %61 = vector.shape_cast %60 : vector<1x128x128xbf16> to vector<128x128xbf16>
    %cst_29 = arith.constant dense<0.000000e+00> : vector<8x128xf32>
    %62 = tpu.matmul %59, %61, %cst_29 {dimension_numbers = #tpu.dot_dimension_numbers<[1], [0], [0], [1], [0, 0, 1, 1], [], []>} : vector<8x128xbf16>, vector<128x128xbf16>, vector<8x128xf32> -> vector<8x128xf32>
    %c2 = arith.constant 2 : index
    %c0_30 = arith.constant 0 : index
    %63 = vector.load %arg3[%c2, %c0_30] : memref<13x128xf32, #tpu.memory_space<vmem>>, vector<1x128xf32>
    %64 = vector.broadcast %63 : vector<1x128xf32> to vector<8x128xf32>
    %65 = arith.addf %62, %64 : vector<8x128xf32>
    %cst_31 = arith.constant 0.000000e+00 : f32
    %66 = vector.broadcast %cst_31 : f32 to vector<8x128xf32>
    %67 = arith.maximumf %65, %66 : vector<8x128xf32>
    %cst_32 = arith.constant dense<0.000000e+00> : vector<128xf32>
    %68 = vector.multi_reduction <add>, %67, %cst_32 [0] : vector<8x128xf32> to vector<128xf32>
    %69 = vector.shape_cast %68 : vector<128xf32> to vector<1x128xf32>
    %cst_33 = arith.constant 8.000000e+00 : f32
    %70 = vector.broadcast %cst_33 : f32 to vector<1x128xf32>
    %71 = arith.divf %69, %70 : vector<1x128xf32>
    %72 = vector.broadcast %71 : vector<1x128xf32> to vector<8x128xf32>
    %73 = arith.subf %67, %72 : vector<8x128xf32>
    %74 = arith.mulf %73, %73 : vector<8x128xf32>
    %cst_34 = arith.constant dense<0.000000e+00> : vector<128xf32>
    %75 = vector.multi_reduction <add>, %74, %cst_34 [0] : vector<8x128xf32> to vector<128xf32>
    %76 = vector.shape_cast %75 : vector<128xf32> to vector<1x128xf32>
    %cst_35 = arith.constant 8.000000e+00 : f32
    %77 = vector.broadcast %cst_35 : f32 to vector<1x128xf32>
    %78 = arith.divf %76, %77 : vector<1x128xf32>
    %c7 = arith.constant 7 : index
    %c0_36 = arith.constant 0 : index
    %79 = vector.load %arg3[%c7, %c0_36] : memref<13x128xf32, #tpu.memory_space<vmem>>, vector<1x128xf32>
    %c11 = arith.constant 11 : index
    %c0_37 = arith.constant 0 : index
    %80 = vector.load %arg3[%c11, %c0_37] : memref<13x128xf32, #tpu.memory_space<vmem>>, vector<1x128xf32>
    %cst_38 = arith.constant 9.99999974E-6 : f32
    %81 = vector.broadcast %cst_38 : f32 to vector<1x128xf32>
    %82 = arith.addf %78, %81 : vector<1x128xf32>
    %83 = math.rsqrt %82 : vector<1x128xf32>
    %84 = arith.mulf %79, %83 : vector<1x128xf32>
    %85 = vector.broadcast %84 : vector<1x128xf32> to vector<8x128xf32>
    %86 = arith.mulf %73, %85 : vector<8x128xf32>
    %87 = vector.broadcast %80 : vector<1x128xf32> to vector<8x128xf32>
    %88 = arith.addf %86, %87 : vector<8x128xf32>
    %89 = arith.truncf %88 : vector<8x128xf32> to vector<8x128xbf16>
    %c2_39 = arith.constant 2 : index
    %c0_40 = arith.constant 0 : index
    %c0_41 = arith.constant 0 : index
    %90 = vector.load %arg2[%c2_39, %c0_40, %c0_41] : memref<4x128x128xbf16, #tpu.memory_space<vmem>>, vector<1x128x128xbf16>
    %91 = vector.shape_cast %90 : vector<1x128x128xbf16> to vector<128x128xbf16>
    %cst_42 = arith.constant dense<0.000000e+00> : vector<8x128xf32>
    %92 = tpu.matmul %89, %91, %cst_42 {dimension_numbers = #tpu.dot_dimension_numbers<[1], [0], [0], [1], [0, 0, 1, 1], [], []>} : vector<8x128xbf16>, vector<128x128xbf16>, vector<8x128xf32> -> vector<8x128xf32>
    %c3 = arith.constant 3 : index
    %c0_43 = arith.constant 0 : index
    %93 = vector.load %arg3[%c3, %c0_43] : memref<13x128xf32, #tpu.memory_space<vmem>>, vector<1x128xf32>
    %94 = vector.broadcast %93 : vector<1x128xf32> to vector<8x128xf32>
    %95 = arith.addf %92, %94 : vector<8x128xf32>
    %cst_44 = arith.constant 0.000000e+00 : f32
    %96 = vector.broadcast %cst_44 : f32 to vector<8x128xf32>
    %97 = arith.maximumf %95, %96 : vector<8x128xf32>
    %cst_45 = arith.constant dense<0.000000e+00> : vector<128xf32>
    %98 = vector.multi_reduction <add>, %97, %cst_45 [0] : vector<8x128xf32> to vector<128xf32>
    %99 = vector.shape_cast %98 : vector<128xf32> to vector<1x128xf32>
    %cst_46 = arith.constant 8.000000e+00 : f32
    %100 = vector.broadcast %cst_46 : f32 to vector<1x128xf32>
    %101 = arith.divf %99, %100 : vector<1x128xf32>
    %102 = vector.broadcast %101 : vector<1x128xf32> to vector<8x128xf32>
    %103 = arith.subf %97, %102 : vector<8x128xf32>
    %104 = arith.mulf %103, %103 : vector<8x128xf32>
    %cst_47 = arith.constant dense<0.000000e+00> : vector<128xf32>
    %105 = vector.multi_reduction <add>, %104, %cst_47 [0] : vector<8x128xf32> to vector<128xf32>
    %106 = vector.shape_cast %105 : vector<128xf32> to vector<1x128xf32>
    %cst_48 = arith.constant 8.000000e+00 : f32
    %107 = vector.broadcast %cst_48 : f32 to vector<1x128xf32>
    %108 = arith.divf %106, %107 : vector<1x128xf32>
    %c8 = arith.constant 8 : index
    %c0_49 = arith.constant 0 : index
    %109 = vector.load %arg3[%c8, %c0_49] : memref<13x128xf32, #tpu.memory_space<vmem>>, vector<1x128xf32>
    %c12 = arith.constant 12 : index
    %c0_50 = arith.constant 0 : index
    %110 = vector.load %arg3[%c12, %c0_50] : memref<13x128xf32, #tpu.memory_space<vmem>>, vector<1x128xf32>
    %cst_51 = arith.constant 9.99999974E-6 : f32
    %111 = vector.broadcast %cst_51 : f32 to vector<1x128xf32>
    %112 = arith.addf %108, %111 : vector<1x128xf32>
    %113 = math.rsqrt %112 : vector<1x128xf32>
    %114 = arith.mulf %109, %113 : vector<1x128xf32>
    %115 = vector.broadcast %114 : vector<1x128xf32> to vector<8x128xf32>
    %116 = arith.mulf %103, %115 : vector<8x128xf32>
    %117 = vector.broadcast %110 : vector<1x128xf32> to vector<8x128xf32>
    %118 = arith.addf %116, %117 : vector<8x128xf32>
    %119 = arith.truncf %118 : vector<8x128xf32> to vector<8x128xbf16>
    %c3_52 = arith.constant 3 : index
    %c0_53 = arith.constant 0 : index
    %c0_54 = arith.constant 0 : index
    %120 = vector.load %arg2[%c3_52, %c0_53, %c0_54] : memref<4x128x128xbf16, #tpu.memory_space<vmem>>, vector<1x128x128xbf16>
    %121 = vector.shape_cast %120 : vector<1x128x128xbf16> to vector<128x128xbf16>
    %cst_55 = arith.constant dense<0.000000e+00> : vector<8x128xf32>
    %122 = tpu.matmul %119, %121, %cst_55 {dimension_numbers = #tpu.dot_dimension_numbers<[1], [0], [0], [1], [0, 0, 1, 1], [], []>} : vector<8x128xbf16>, vector<128x128xbf16>, vector<8x128xf32> -> vector<8x128xf32>
    %c4 = arith.constant 4 : index
    %c0_56 = arith.constant 0 : index
    %123 = vector.load %arg3[%c4, %c0_56] : memref<13x128xf32, #tpu.memory_space<vmem>>, vector<1x128xf32>
    %124 = vector.broadcast %123 : vector<1x128xf32> to vector<8x128xf32>
    %125 = arith.addf %122, %124 : vector<8x128xf32>
    %126 = vector.extract_strided_slice %125 {offsets = [0, 0], sizes = [8, 4], strides = [1, 1]} : vector<8x128xf32> to vector<8x4xf32>
    %127 = math.tanh %126 : vector<8x4xf32>
    %c0_57 = arith.constant 0 : index
    %c0_58 = arith.constant 0 : index
    %128 = vector.load %arg4[%c0_57, %c0_58] : memref<8x4xf32, #tpu.memory_space<vmem>>, vector<8x4xf32>
    tpu.vector_store %arg4[%c0_57, %c0_58], %127 {strides = array<i32>} : memref<8x4xf32, #tpu.memory_space<vmem>>, vector<8x4xf32>,
    return
  }
}

</mosaic_0001>

<bundles_post_ra>
// kernel: tpu_custom_call.1
= control target key start
LH: loop header
LB: loop body
LE: loop exit
PB: predicated region body
PF: predicated region fallthrough
CT: control target
= control target key end

     0   :  { %9 = vsyncpa [#allocation3], 0  ;;  %s1194_s0 = inlined_call_operand.hbm [shape: f32[8,16], index: 0, kind: input, shape index: {}]   ;;  %s1195_s1 = inlined_call_operand.hbm [shape: f32[16,128], index: 1, kind: input, shape index: {}]   ;;  %s1196_s2 = inlined_call_operand.hbm [shape: bf16[4,128,128], index: 2, kind: input, shape index: {}]   ;;  %s1197_s3 = inlined_call_operand.hbm [shape: f32[13,128], index: 3, kind: input, shape index: {}]   ;;  %s1198_s4 = inlined_call_operand.vmem [shape: f32[8,4], index: 4, kind: output, shape index: {}]  }
   0x1   :  { %10 = vsyncpa [#allocation5], 0 }
   0x2   :  { %11 = vsyncpa [#allocation8], 0  ;;  %s1053_s15 = smov [#allocation4]   ;;  %s959_s19 = scalar_lea.hbm %s1195_s1, 256 }
   0x3   :  { %s27_s16 = sshll.u32 %s1053_s15, 4  ;;  %p960_p0 = scmp.ne.s32.totalorder %s1195_s1, %s959_s19  ;;  %s28_s16 = int_to_ptr.vmem [resolvable:$true] %s27_s16 }
   0x4   :  { %p963_p1 = scmp.lt.u32.totalorder %s959_s19, %s1195_s1 }
   0x6   :  { %p965_p2 = pnand %p963_p1, %p960_p0 }
   0x8   :  { %968 = shalt.err (!%p965_p2)
}
   0x9   :  { %s969_s24 = scalar_lea.vmem %s28_s16, 256  ;;  %p974_p4 = scmp.lt.s32.totalorder %s28_s16, %s28_s16 }
   0xa   :  { %p970_p3 = scmp.ne.s32.totalorder %s28_s16, %s969_s24  ;;  %p975_p5 = scmp.lt.s32.totalorder %s969_s24, %s969_s24 }
   0xc   :  { %p976_p6 = por %p975_p5, %p974_p4 }
   0xe   :  { %p977_p7 = pnand %p976_p6, %p970_p3 }
  0x10   :  { %980 = shalt.err (!%p977_p7)
}
  0x11   :  { %s1054_s25 = smov 128   ;;  %s1055_s26 = smov 8  }
  0x12   :  { %33 = dma.hbm_to_vmem [thread:$0]  %s1195_s1, 256, %s28_s16, [#allocation5], %s1054_s25, %s1054_s25, %s1055_s26  }
  0x13   :  { %s1056_s29 = smov [#allocation2]   ;;  %s1057_s5 = smov [#allocation6]  }
  0x14   :  { %s18_s30 = sshll.u32 %s1056_s29, 4  ;;  %s39_s6 = sshll.u32 %s1057_s5, 4  ;;  %s19_s30 = int_to_ptr.vmem [resolvable:$true] %s18_s30  ;;  %s40_s6 = int_to_ptr.vmem [resolvable:$true] %s39_s6 }
  0x15   :  { %s981_s9 = scalar_lea.hbm %s1194_s0, 128 }
  0x16   :  { %p982_p8 = scmp.ne.s32.totalorder %s1194_s0, %s981_s9  ;;  %p985_p9 = scmp.lt.u32.totalorder %s981_s9, %s1194_s0 }
  0x18   :  { %p987_p10 = pnand %p985_p9, %p982_p8 }
  0x1a   :  { %990 = shalt.err (!%p987_p10)
}
  0x1b   :  { %s991_s1 = scalar_lea.vmem %s19_s30, 128  ;;  %p996_p12 = scmp.lt.s32.totalorder %s19_s30, %s19_s30 }
  0x1c   :  { %p992_p11 = scmp.ne.s32.totalorder %s19_s30, %s991_s1  ;;  %p997_p13 = scmp.lt.s32.totalorder %s991_s1, %s991_s1 }
  0x1e   :  { %p998_p0 = por %p997_p13, %p996_p12 }
  0x20   :  { %p999_p1 = pnand %p998_p0, %p992_p11 }
  0x22   :  { %1002 = shalt.err (!%p999_p1)
}
  0x23   :  { %21 = dma.hbm_to_vmem [thread:$0]  %s1194_s0, 128, %s19_s30, [#allocation3]  }
  0x24   :  { %s1003_s18 = scalar_lea.hbm %s1196_s2, 4096 }
  0x25   :  { %p1004_p2 = scmp.ne.s32.totalorder %s1196_s2, %s1003_s18  ;;  %p1007_p3 = scmp.lt.u32.totalorder %s1003_s18, %s1196_s2 }
  0x27   :  { %p1009_p4 = pnand %p1007_p3, %p1004_p2 }
  0x29   :  { %1012 = shalt.err (!%p1009_p4)
}
  0x2a   :  { %s1013_s23 = scalar_lea.vmem %s40_s6, 4096  ;;  %p1018_p6 = scmp.lt.s32.totalorder %s40_s6, %s40_s6 }
  0x2b   :  { %p1014_p5 = scmp.ne.s32.totalorder %s40_s6, %s1013_s23  ;;  %p1019_p7 = scmp.lt.s32.totalorder %s1013_s23, %s1013_s23 }
  0x2d   :  { %p1020_p8 = por %p1019_p7, %p1018_p6 }
  0x2f   :  { %p1021_p9 = pnand %p1020_p8, %p1014_p5 }
  0x31   :  { %1024 = shalt.err (!%p1021_p9)
}
  0x32   :  { %s1058_s0 = smov 64   ;;  %s1059_s24 = smov 4  }
  0x33   :  { %45 = dma.hbm_to_vmem [thread:$0]  %s1196_s2, 4096, %s40_s6, [#allocation5], %s1058_s0, %s1058_s0, %s1059_s24  }
  0x34   :  { %s1060_s29 = smov [#allocation7]   ;;  %s1025_s8 = scalar_lea.hbm %s1197_s3, 256 }
  0x35   :  { %s51_s30 = sshll.u32 %s1060_s29, 4  ;;  %p1026_p10 = scmp.ne.s32.totalorder %s1197_s3, %s1025_s8  ;;  %s52_s30 = int_to_ptr.vmem [resolvable:$true] %s51_s30 }
  0x36   :  { %p1029_p11 = scmp.lt.u32.totalorder %s1025_s8, %s1197_s3 }
  0x38   :  { %p1031_p12 = pnand %p1029_p11, %p1026_p10 }
  0x3a   :  { %1034 = shalt.err (!%p1031_p12)
}
  0x3b   :  { %s1035_s13 = scalar_lea.vmem %s52_s30, 256  ;;  %p1040_p0 = scmp.lt.s32.totalorder %s52_s30, %s52_s30 }
  0x3c   :  { %p1036_p13 = scmp.ne.s32.totalorder %s52_s30, %s1035_s13  ;;  %p1041_p1 = scmp.lt.s32.totalorder %s1035_s13, %s1035_s13 }
  0x3e   :  { %p1042_p2 = por %p1041_p1, %p1040_p0 }
  0x40   :  { %p1043_p3 = pnand %p1042_p2, %p1036_p13 }
  0x42   :  { %1046 = shalt.err (!%p1043_p3)
}
  0x43   :  { %57 = dma.hbm_to_vmem [thread:$0]  %s1197_s3, 256, %s52_s30, [#allocation8], %s1054_s25, %s1054_s25, %s1055_s26  }
  0x44   :  { %1047 = dma.done.wait [#allocation3], 128  }
  0x45   :  { %1048 = vsyncadd [#allocation3], 4294967168 }
  0x46   :  { %1049 = dma.done.wait [#allocation5], 4352  }
  0x47   :  { %1050 = vsyncadd [#allocation5], 4294962944 }
  0x48   :  { %1051 = dma.done.wait [#allocation8], 256  }
  0x49   :  { %1052 = vsyncadd [#allocation8], 4294967040  ;;  %v1061_v0 = vmov 0.0|0.0   ;;  %vm1062_vm0 = vmmov 0   ;;  %v1063_v1 = vmov 0.0   ;;  %v72_v2 = vld [vmem:[#allocation4] sm:$0xff]  ;;  %v176_v36 = vlaneseq }
  0x4a   :  { %903 = vmatprep.subr.bf16.mxu0 %v1061_v0  ;;  %820 = vmatprep.mubr.msk.f32.mxu0 %vm1062_vm0, %v1063_v1  ;;  %v73_v3 = vld [vmem:[#allocation4 + $0x8] sm:$0xff]  ;;  %v71_v5 = vld [vmem:[#allocation2] sm:$0xff]  ;;  %vm79_vm1 = vcmask 130048   ;;  %v917_v6 = vld [vmem:[#allocation6] sm:$0xff]   ;;  %vm726_vm2 = vcmask 31744  }
  0x4b   :  { %823 = vmatprep.subr.bf16.mxu1 %v1063_v1  ;;  %839 = vmatprep.mubr.msk.bf16.mxu1 %vm1062_vm0, %v1063_v1  ;;  %v904_v4 = vpack.c.bf16 %v73_v3, %v72_v2  ;;  %v918_v7 = vld [vmem:[#allocation6 + $0x8] sm:$0xff]   ;;  %v919_v8 = vld [vmem:[#allocation6 + $0x10] sm:$0xff]   ;;  %v920_v9 = vld [vmem:[#allocation6 + $0x18] sm:$0xff]   ;;  %v177_v37 = vshrl.u32 %v176_v36, 7 }
  0x4c   :  { %824 = vmatpush3.bf16.msra.mxu1 %v917_v6  ;;  %v921_v10 = vld [vmem:[#allocation6 + $0x20] sm:$0xff]   ;;  %v922_v11 = vld [vmem:[#allocation6 + $0x28] sm:$0xff]   ;;  %v923_v12 = vld [vmem:[#allocation6 + $0x30] sm:$0xff]  }
  0x4d   :  { %905 = vmatpush3.bf16.msra.mxu0 %v904_v4  ;;  %825 = vmatprep.subr.bf16.mxu1 %v1063_v1  ;;  %v924_v13 = vld [vmem:[#allocation6 + $0x38] sm:$0xff]   ;;  %v735_v14 = vld [vmem:[#allocation7] ss:$0 sm:$0xff]  ;;  %v171_v38 = vld [vmem:[#allocation7 + $0x5] sm:$0x1]  ;;  %v1159_v39 = vsub.s32 0, %v177_v37 }
  0x4e   :  { %843 = vmatprep.subr.bf16.mxu0 %v1063_v1  ;;  %v737_v43 = vld [vmem:[#allocation7 + $0x9] ss:$0 sm:$0xff]  ;;  %v925_v47 = vld [vmem:[#allocation6 + $0x40] sm:$0xff]   ;;  %v927_v49 = vld [vmem:[#allocation6 + $0x50] sm:$0xff]  }
  0x4f   :  { %v926_v48 = vld [vmem:[#allocation6 + $0x48] sm:$0xff]   ;;  %v928_v50 = vld [vmem:[#allocation6 + $0x58] sm:$0xff]   ;;  %v929_v51 = vld [vmem:[#allocation6 + $0x60] sm:$0xff]  }
  0x50   :  { %821 = vmatmul.mubr.msk.f32.vlgmr.msra.gmra.mrb[0].mxu0 %vm79_vm1, %v71_v5  ;;  %826 = vmatpush3.bf16.msra.mxu1 %v918_v7  ;;  %v930_v52 = vld [vmem:[#allocation6 + $0x68] sm:$0xff]   ;;  %v931_v53 = vld [vmem:[#allocation6 + $0x70] sm:$0xff]   ;;  %v932_v54 = vld [vmem:[#allocation6 + $0x78] sm:$0xff]  }
  0x51   :  { %859 = vmatprep.mubr.msk.bf16.mxu0 %vm1062_vm0, %v1063_v1  ;;  %827 = vmatprep.subr.bf16.mxu1 %v1063_v1  ;;  %v738_v55 = vld [vmem:[#allocation7 + $0x1] ss:$0 sm:$0xff] }
  0x52   :  { %844 = vmatpush3.bf16.msra.mxu0 %v925_v47 }
  0x53   :  { %845 = vmatprep.subr.bf16.mxu0 %v1063_v1 }
  0x54   :  { %828 = vmatpush3.bf16.msra.mxu1 %v919_v8 }
  0x55   :  { %829 = vmatprep.subr.bf16.mxu1 %v1063_v1 }
  0x56   :  { %846 = vmatpush3.bf16.msra.mxu0 %v926_v48 }
  0x57   :  { %847 = vmatprep.subr.bf16.mxu0 %v1063_v1 }
  0x58   :  { %830 = vmatpush3.bf16.msra.mxu1 %v920_v9 }
  0x59   :  { %831 = vmatprep.subr.bf16.mxu1 %v1063_v1 }
  0x5a   :  { %848 = vmatpush3.bf16.msra.mxu0 %v927_v49 }
  0x5b   :  { %849 = vmatprep.subr.bf16.mxu0 %v1063_v1 }
  0x5c   :  { %832 = vmatpush3.bf16.msra.mxu1 %v921_v10 }
  0x5d   :  { %833 = vmatprep.subr.bf16.mxu1 %v1063_v1 }
  0x5e   :  { %850 = vmatpush3.bf16.msra.mxu0 %v928_v50 }
  0x5f   :  { %851 = vmatprep.subr.bf16.mxu0 %v1063_v1 }
  0x60   :  { %834 = vmatpush3.bf16.msra.mxu1 %v922_v11 }
  0x61   :  { %835 = vmatprep.subr.bf16.mxu1 %v1063_v1 }
  0x62   :  { %852 = vmatpush3.bf16.msra.mxu0 %v929_v51 }
  0x63   :  { %853 = vmatprep.subr.bf16.mxu0 %v1063_v1 }
  0x64   :  { %836 = vmatpush3.bf16.msra.mxu1 %v923_v12 }
  0x65   :  { %837 = vmatprep.subr.bf16.mxu1 %v1063_v1 }
  0x66   :  { %854 = vmatpush3.bf16.msra.mxu0 %v930_v52 }
  0x67   :  { %855 = vmatprep.subr.bf16.mxu0 %v1063_v1 }
  0x68   :  { %838 = vmatpush3.bf16.msra.mxu1 %v924_v13 }
  0x69   :  { %863 = vmatprep.subr.bf16.mxu1 %v1063_v1 }
  0x6a   :  { %856 = vmatpush3.bf16.msra.mxu0 %v931_v53 }
  0x6b   :  { %857 = vmatprep.subr.bf16.mxu0 %v1063_v1 }
  0x6e   :  { %858 = vmatpush3.bf16.msra.mxu0 %v932_v54 }
  0x6f   :  { %883 = vmatprep.subr.bf16.mxu0 %v1063_v1 }
 0x123   :  { %v149_v15 = vpop.f32.mrb[0].mxu0 }
 0x124   :  { %v150_v16 = vadd.f32 %v735_v14, %v149_v15  ;;  %v822_v17 = vpop.f32.mrb[1].mxu0 }
 0x126   :  { %v153_v18 = vmax.f32 %v150_v16, 0.0  ;;  %v313_v16 = vld [vmem:[#allocation7 + $0x6] sm:$0x1] }
 0x128   :  { %v154_v19 = vrot.slane %v153_v18, 4 }
 0x12a   :  { %v155_v20 = vadd.f32 %v154_v19, %v153_v18 }
 0x12c   :  { %v156_v21 = vrot.slane %v155_v20, 2 }
 0x12e   :  { %v157_v22 = vadd.f32 %v156_v21, %v155_v20  ;;  %v747_v20 = vld [vmem:[#allocation7 + $0xa] ss:$0 sm:$0xff] }
 0x130   :  { %v158_v23 = vrot.slane %v157_v22, 1 }
 0x132   :  { %v159_v24 = vadd.f32 %v158_v23, %v157_v22 }
 0x134   :  { %v161_v25 = vmul.f32 0.125, %v159_v24  ;;  %v933_v24 = vld [vmem:[#allocation6 + $0x80] sm:$0xff]  }
 0x136   :  { %v162_v26 = vsub.f32 %v153_v18, %v161_v25  ;;  %v934_v25 = vld [vmem:[#allocation6 + $0x88] sm:$0xff]  }
 0x138   :  { %v163_v27 = vmul.f32 %v162_v26, %v162_v26 }
 0x13a   :  { %v164_v28 = vrot.slane %v163_v27, 4 }
 0x13c   :  { %v165_v29 = vadd.f32 %v164_v28, %v163_v27  ;;  %v936_v27 = vld [vmem:[#allocation6 + $0x98] sm:$0xff]   ;;  %v937_v28 = vld [vmem:[#allocation6 + $0xa0] sm:$0xff]  }
 0x13e   :  { %v166_v30 = vrot.slane %v165_v29, 2 }
 0x140   :  { %v167_v31 = vadd.f32 %v166_v30, %v165_v29  ;;  %v938_v29 = vld [vmem:[#allocation6 + $0xa8] sm:$0xff]   ;;  %v939_v30 = vld [vmem:[#allocation6 + $0xb0] sm:$0xff]  }
 0x142   :  { %v168_v32 = vrot.slane %v167_v31, 1 }
 0x144   :  { %v169_v33 = vadd.f32 %v168_v32, %v167_v31  ;;  %v940_v31 = vld [vmem:[#allocation6 + $0xb8] sm:$0xff]   ;;  %v748_v32 = vld [vmem:[#allocation7 + $0x2] ss:$0 sm:$0xff] }
 0x146   :  { %v170_v34 = vmul.f32 0.125, %v169_v33 }
 0x148   :  { %v173_v35 = vadd.f32 1e-05, %v170_v34 }
 0x14a   :  { %949 = vrsqrt.f32 %v173_v35 }
 0x154   :  { %v950_v40 = vpop.eup %949 }
 0x155   :  { %v175_v41 = vmul.f32 %v950_v40, %v171_v38 }
 0x157   :  { %v179_v42 = vrot.slane %v175_v41, %v1159_v39 }
 0x159   :  { %v180_v44 = vmul.f32 %v179_v42, %v162_v26  ;;  %v935_v26 = vld [vmem:[#allocation6 + $0x90] sm:$0xff]  }
 0x15b   :  { %v185_v45 = vadd.f32 %v737_v43, %v180_v44 }
 0x15d   :  { %v186_v46 = vpack.c.bf16 %v185_v45, %v185_v45 }
 0x15f   :  { %840 = vmatmul.mubr.bf16.vlgmr.msra.gmra.mrb[0].mxu1 %v186_v46 }
 0x160   :  { %879 = vmatprep.mubr.msk.bf16.mxu1 %vm1062_vm0, %v1063_v1  ;;  %864 = vmatpush3.bf16.msra.mxu1 %v933_v24 }
 0x161   :  { %865 = vmatprep.subr.bf16.mxu1 %v1063_v1 }
 0x164   :  { %866 = vmatpush3.bf16.msra.mxu1 %v934_v25 }
 0x165   :  { %867 = vmatprep.subr.bf16.mxu1 %v1063_v1 }
 0x168   :  { %868 = vmatpush3.bf16.msra.mxu1 %v935_v26 }
 0x169   :  { %869 = vmatprep.subr.bf16.mxu1 %v1063_v1 }
 0x16c   :  { %870 = vmatpush3.bf16.msra.mxu1 %v936_v27 }
 0x16d   :  { %871 = vmatprep.subr.bf16.mxu1 %v1063_v1 }
 0x170   :  { %872 = vmatpush3.bf16.msra.mxu1 %v937_v28 }
 0x171   :  { %873 = vmatprep.subr.bf16.mxu1 %v1063_v1 }
 0x174   :  { %874 = vmatpush3.bf16.msra.mxu1 %v938_v29 }
 0x175   :  { %875 = vmatprep.subr.bf16.mxu1 %v1063_v1 }
 0x178   :  { %876 = vmatpush3.bf16.msra.mxu1 %v939_v30 }
 0x179   :  { %877 = vmatprep.subr.bf16.mxu1 %v1063_v1 }
 0x17c   :  { %878 = vmatpush3.bf16.msra.mxu1 %v940_v31 }
 0x232   :  { %v290_v56 = vpop.f32.mrb[0].mxu1 }
 0x233   :  { %v291_v57 = vadd.f32 %v738_v55, %v290_v56  ;;  %v841_v58 = vpop.f32.mrb[1].mxu1 }
 0x234   :  { %v293_v59 = vpop.f32.mrb[2].mxu1 }
 0x235   :  { %v296_v60 = vmax.f32 %v291_v57, 0.0  ;;  %v842_v61 = vpop.f32.mrb[3].mxu1  ;;  %v456_v57 = vld [vmem:[#allocation7 + $0x7] sm:$0x1] }
 0x236   :  { %v757_v61 = vld [vmem:[#allocation7 + $0xb] ss:$0 sm:$0xff] }
 0x237   :  { %v297_v62 = vrot.slane %v296_v60, 4 }
 0x239   :  { %v298_v63 = vadd.f32 %v297_v62, %v296_v60 }
 0x23b   :  { %v299_v0 = vrot.slane %v298_v63, 2 }
 0x23d   :  { %v300_v2 = vadd.f32 %v299_v0, %v298_v63 }
 0x23f   :  { %v301_v3 = vrot.slane %v300_v2, 1 }
 0x241   :  { %v302_v4 = vadd.f32 %v301_v3, %v300_v2  ;;  %v941_v2 = vld [vmem:[#allocation6 + $0xc0] sm:$0xff]   ;;  %v942_v3 = vld [vmem:[#allocation6 + $0xc8] sm:$0xff]  }
 0x243   :  { %v303_v5 = vmul.f32 0.125, %v302_v4  ;;  %v943_v4 = vld [vmem:[#allocation6 + $0xd0] sm:$0xff]  }
 0x245   :  { %v304_v6 = vsub.f32 %v296_v60, %v303_v5  ;;  %v944_v5 = vld [vmem:[#allocation6 + $0xd8] sm:$0xff]  }
 0x247   :  { %v305_v7 = vmul.f32 %v304_v6, %v304_v6 }
 0x249   :  { %v306_v8 = vrot.slane %v305_v7, 4 }
 0x24b   :  { %v307_v9 = vadd.f32 %v306_v8, %v305_v7  ;;  %v946_v7 = vld [vmem:[#allocation6 + $0xe8] sm:$0xff]   ;;  %v947_v8 = vld [vmem:[#allocation6 + $0xf0] sm:$0xff]  }
 0x24d   :  { %v308_v10 = vrot.slane %v307_v9, 2 }
 0x24f   :  { %v309_v11 = vadd.f32 %v308_v10, %v307_v9  ;;  %v948_v9 = vld [vmem:[#allocation6 + $0xf8] sm:$0xff]   ;;  %v758_v10 = vld [vmem:[#allocation7 + $0x3] ss:$0 sm:$0xff] }
 0x251   :  { %v310_v12 = vrot.slane %v309_v11, 1 }
 0x253   :  { %v311_v13 = vadd.f32 %v310_v12, %v309_v11 }
 0x255   :  { %v312_v14 = vmul.f32 0.125, %v311_v13 }
 0x257   :  { %v315_v15 = vadd.f32 1e-05, %v312_v14 }
 0x259   :  { %951 = vrsqrt.f32 %v315_v15 }
 0x263   :  { %v952_v17 = vpop.eup %951 }
 0x264   :  { %v317_v18 = vmul.f32 %v952_v17, %v313_v16 }
 0x266   :  { %v321_v19 = vrot.slane %v317_v18, %v1159_v39 }
 0x268   :  { %v322_v21 = vmul.f32 %v321_v19, %v304_v6  ;;  %v945_v6 = vld [vmem:[#allocation6 + $0xe0] sm:$0xff]  }
 0x26a   :  { %v327_v22 = vadd.f32 %v747_v20, %v322_v21 }
 0x26c   :  { %v328_v23 = vpack.c.bf16 %v327_v22, %v327_v22 }
 0x26e   :  { %860 = vmatmul.mubr.bf16.vlgmr.msra.gmra.mrb[4].mxu0 %v328_v23 }
 0x26f   :  { %899 = vmatprep.mubr.msk.bf16.mxu0 %vm1062_vm0, %v1063_v1  ;;  %884 = vmatpush3.bf16.msra.mxu0 %v941_v2 }
 0x270   :  { %885 = vmatprep.subr.bf16.mxu0 %v1063_v1 }
 0x273   :  { %886 = vmatpush3.bf16.msra.mxu0 %v942_v3 }
 0x274   :  { %887 = vmatprep.subr.bf16.mxu0 %v1063_v1 }
 0x277   :  { %888 = vmatpush3.bf16.msra.mxu0 %v943_v4 }
 0x278   :  { %889 = vmatprep.subr.bf16.mxu0 %v1063_v1 }
 0x27b   :  { %890 = vmatpush3.bf16.msra.mxu0 %v944_v5 }
 0x27c   :  { %891 = vmatprep.subr.bf16.mxu0 %v1063_v1 }
 0x27f   :  { %892 = vmatpush3.bf16.msra.mxu0 %v945_v6 }
 0x280   :  { %893 = vmatprep.subr.bf16.mxu0 %v1063_v1 }
 0x283   :  { %894 = vmatpush3.bf16.msra.mxu0 %v946_v7 }
 0x284   :  { %895 = vmatprep.subr.bf16.mxu0 %v1063_v1 }
 0x287   :  { %896 = vmatpush3.bf16.msra.mxu0 %v947_v8 }
 0x288   :  { %897 = vmatprep.subr.bf16.mxu0 %v1063_v1 }
 0x28b   :  { %898 = vmatpush3.bf16.msra.mxu0 %v948_v9 }
 0x341   :  { %v433_v33 = vpop.f32.mrb[4].mxu0 }
 0x342   :  { %v434_v34 = vadd.f32 %v748_v32, %v433_v33  ;;  %v861_v35 = vpop.f32.mrb[5].mxu0  ;;  %v599_v33 = vld [vmem:[#allocation7 + $0x8] sm:$0x1] }
 0x343   :  { %v436_v36 = vpop.f32.mrb[6].mxu0 }
 0x344   :  { %v439_v37 = vmax.f32 %v434_v34, 0.0  ;;  %v862_v38 = vpop.f32.mrb[7].mxu0 }
 0x346   :  { %v440_v40 = vrot.slane %v439_v37, 4 }
 0x348   :  { %v441_v41 = vadd.f32 %v440_v40, %v439_v37 }
 0x34a   :  { %v442_v42 = vrot.slane %v441_v41, 2 }
 0x34c   :  { %v443_v43 = vadd.f32 %v442_v42, %v441_v41  ;;  %v768_v42 = vld [vmem:[#allocation7 + $0x4] ss:$0 sm:$0xff] }
 0x34e   :  { %v444_v44 = vrot.slane %v443_v43, 1 }
 0x350   :  { %v445_v45 = vadd.f32 %v444_v44, %v443_v43 }
 0x352   :  { %v446_v46 = vmul.f32 0.125, %v445_v45 }
 0x354   :  { %v447_v47 = vsub.f32 %v439_v37, %v446_v46  ;;  %v767_v37 = vld [vmem:[#allocation7 + $0xc] ss:$0 sm:$0xff] }
 0x356   :  { %v448_v48 = vmul.f32 %v447_v47, %v447_v47 }
 0x358   :  { %v449_v49 = vrot.slane %v448_v48, 4 }
 0x35a   :  { %v450_v50 = vadd.f32 %v449_v49, %v448_v48 }
 0x35c   :  { %v451_v51 = vrot.slane %v450_v50, 2 }
 0x35e   :  { %v452_v52 = vadd.f32 %v451_v51, %v450_v50 }
 0x360   :  { %v453_v53 = vrot.slane %v452_v52, 1 }
 0x362   :  { %v454_v54 = vadd.f32 %v453_v53, %v452_v52 }
 0x364   :  { %v455_v55 = vmul.f32 0.125, %v454_v54 }
 0x366   :  { %v458_v56 = vadd.f32 1e-05, %v455_v55 }
 0x368   :  { %953 = vrsqrt.f32 %v458_v56 }
 0x372   :  { %v954_v58 = vpop.eup %953 }
 0x373   :  { %v460_v59 = vmul.f32 %v954_v58, %v456_v57 }
 0x375   :  { %v464_v60 = vrot.slane %v460_v59, %v1159_v39 }
 0x377   :  { %v465_v62 = vmul.f32 %v464_v60, %v447_v47 }
 0x379   :  { %v470_v63 = vadd.f32 %v757_v61, %v465_v62 }
 0x37b   :  { %v471_v0 = vpack.c.bf16 %v470_v63, %v470_v63 }
 0x37d   :  { %880 = vmatmul.mubr.bf16.vlgmr.msra.gmra.mrb[4].mxu1 %v471_v0 }
 0x450   :  { %v576_v11 = vpop.f32.mrb[4].mxu1 }
 0x451   :  { %v577_v12 = vadd.f32 %v758_v10, %v576_v11  ;;  %v881_v13 = vpop.f32.mrb[5].mxu1 }
 0x452   :  { %v579_v14 = vpop.f32.mrb[6].mxu1 }
 0x453   :  { %v582_v15 = vmax.f32 %v577_v12, 0.0  ;;  %v882_v16 = vpop.f32.mrb[7].mxu1 }
 0x455   :  { %v583_v17 = vrot.slane %v582_v15, 4 }
 0x457   :  { %v584_v18 = vadd.f32 %v583_v17, %v582_v15 }
 0x459   :  { %v585_v19 = vrot.slane %v584_v18, 2 }
 0x45b   :  { %v586_v20 = vadd.f32 %v585_v19, %v584_v18 }
 0x45d   :  { %v587_v21 = vrot.slane %v586_v20, 1 }
 0x45f   :  { %v588_v22 = vadd.f32 %v587_v21, %v586_v20 }
 0x461   :  { %v589_v23 = vmul.f32 0.125, %v588_v22 }
 0x463   :  { %v590_v24 = vsub.f32 %v582_v15, %v589_v23 }
 0x465   :  { %v591_v25 = vmul.f32 %v590_v24, %v590_v24 }
 0x467   :  { %v592_v26 = vrot.slane %v591_v25, 4 }
 0x469   :  { %v593_v1 = vadd.f32 %v592_v26, %v591_v25 }
 0x46b   :  { %v594_v27 = vrot.slane %v593_v1, 2 }
 0x46d   :  { %v595_v28 = vadd.f32 %v594_v27, %v593_v1 }
 0x46f   :  { %v596_v29 = vrot.slane %v595_v28, 1 }
 0x471   :  { %v597_v30 = vadd.f32 %v596_v29, %v595_v28 }
 0x473   :  { %v598_v31 = vmul.f32 0.125, %v597_v30 }
 0x475   :  { %v601_v32 = vadd.f32 1e-05, %v598_v31 }
 0x477   :  { %955 = vrsqrt.f32 %v601_v32 }
 0x481   :  { %v956_v34 = vpop.eup %955 }
 0x482   :  { %v603_v35 = vmul.f32 %v956_v34, %v599_v33 }
 0x484   :  { %v607_v36 = vrot.slane %v603_v35, %v1159_v39 }
 0x486   :  { %v608_v38 = vmul.f32 %v607_v36, %v590_v24 }
 0x488   :  { %v613_v40 = vadd.f32 %v767_v37, %v608_v38 }
 0x48a   :  { %v614_v41 = vpack.c.bf16 %v613_v40, %v613_v40 }
 0x48c   :  { %900 = vmatmul.mubr.bf16.vlgmr.msra.gmra.mrb[8].mxu0 %v614_v41 }
 0x55f   :  { %v719_v43 = vpop.f32.mrb[8].mxu0 }
 0x560   :  { %v720_v44 = vadd.f32 %v768_v42, %v719_v43  ;;  %v901_v45 = vpop.f32.mrb[9].mxu0 }
 0x561   :  { %v722_v46 = vpop.f32.mrb[10].mxu0 }
 0x562   :  { %957 = vtanh.f32 %v720_v44  ;;  %v902_v47 = vpop.f32.mrb[11].mxu0 }
 0x56c   :  { %v958_v48 = vpop.eup %957 }
 0x56d   :  { %727 = vst.msk [vmem:[%s1198_s4] sm:$0xff] %vm726_vm2, %v958_v48 }
 0x56e   :  { %732 = vsyncpa [#allocation3], 1 }
 0x56f   :  { %733 = vsyncpa [#allocation5], 1 }
 0x570   :  { %734 = vsyncpa [#allocation8], 1 }

</bundles_post_ra>
